<compile_context>
chip_gen: v7x
topology: tpu7x:2x2x1
jax: 0.10.0
libtpu: 0.0.40
codegen_flags: <defaults>
</compile_context>

<pallas_src>
import functools

import jax
import jax.numpy as jnp
import numpy as np
from jax.experimental import pallas as pl
from jax.experimental.pallas import tpu as pltpu


def _causal_conv1d_kernel(x_ref, w_ref, b_ref, o_ref, *scratch, kernel_size,
                          dilation, l_tile, pad_lanes, precision):
    """One (batch, C_out-tile, L-tile) grid step.

    x_ref   : (1, C_in, l_tile)        current activation tile (input dtype)
    w_ref   : (co_tile, K*C_in)        stacked weight, VMEM-resident across grid
    b_ref   : (co_tile, 1)             bias
    o_ref   : (1, co_tile, l_tile)     output tile (lane-dense store)
    scratch : optionally (C_in, pad_lanes) carry of the previous tile's tail.

    NOTE: the carry is only correct because the L axis is the innermost grid
    axis, is marked "arbitrary", and is reset at l == 0 for every (b, j).
    Do not reorder the grid or mark L "parallel".
    """
    xb = x_ref[0]                                   # (C_in, l_tile), input dtype

    if pad_lanes > 0:
        prev_ref = scratch[0]

        # New (batch, C_out-tile) pair -> no history: the causal left-pad is
        # implicit zeros.
        @pl.when(pl.program_id(2) == 0)
        def _():
            prev_ref[...] = jnp.zeros(prev_ref.shape, prev_ref.dtype)

        # (C_in, pad_lanes + l_tile): previous tail | current tile.
        x_ext = jnp.concatenate([prev_ref[...], xb], axis=-1)

        # Carry only the receptive-field tail (128-lane aligned slice/store).
        prev_ref[...] = xb[:, l_tile - pad_lanes:]
    else:
        x_ext = xb

    # Build the K causally-shifted windows as STATIC lane slices of x_ext and
    # stack them along the channel (sublane) axis -> one deep MXU contraction.
    # start = pad_lanes - shift is always in [pad_lanes - pad, pad_lanes] >= 0.
    windows = []
    for k in range(kernel_size):
        shift = dilation * (kernel_size - 1 - k)    # how far this tap looks back
        start = pad_lanes - shift
        windows.append(x_ext[:, start:start + l_tile])
    x_stacked = windows[0] if kernel_size == 1 else jnp.concatenate(windows, axis=0)

    # Single MXU matmul, f32 accumulation; operands stay in the input dtype.
    acc = jnp.dot(w_ref[...], x_stacked,
                  preferred_element_type=jnp.float32, precision=precision)

    # Bias added once to the f32 accumulator; single lane-dense store.
    o_ref[0] = (acc + b_ref[...].astype(jnp.float32)).astype(o_ref.dtype)


def _vmem_estimate_bytes(c_in, co_tile, l_tile, kernel_size, pad, dt_bytes):
    """Rough per-step VMEM working set (double-buffered I/O + in-kernel temps)."""
    pad_lanes = 0 if pad == 0 else min(l_tile, -(-pad // 128) * 128)
    x_io = 2 * c_in * l_tile * dt_bytes
    o_io = 2 * co_tile * l_tile * dt_bytes
    w_io = 2 * co_tile * kernel_size * c_in * dt_bytes
    carry = c_in * pad_lanes * dt_bytes
    stacked = kernel_size * c_in * (l_tile + pad_lanes) * dt_bytes
    acc = co_tile * l_tile * 4
    return x_io + o_io + w_io + carry + stacked + acc


def causal_conv1d(x, weight, bias=None, *, dilation=1, l_tile=None, co_tile=None,
                  precision=None, vmem_limit_bytes=48 * 1024 * 1024,
                  vmem_budget_bytes=40 * 1024 * 1024):
    """y = Conv1d(left_zero_pad(x, dilation*(K-1)), weight, bias, dilation=dilation).

    x: (N, C_in, L)   weight: (C_out, C_in, K)   bias: (C_out,) or None
    """
    n, c_in, length = x.shape
    c_out, c_in_w, kernel_size = weight.shape
    assert c_in_w == c_in, "groups != 1 is not supported"
    pad = dilation * (kernel_size - 1)
    dt_bytes = jnp.dtype(x.dtype).itemsize

    # C_out tiling: gives a second "parallel" grid axis (useful on v7x when
    # N == 1) and bounds the weight/output tile size for large channel counts.
    if co_tile is None:
        co_tile = c_out
        if c_out >= 512:
            for cand in (256, 128):
                if c_out % cand == 0:
                    co_tile = cand
                    break
    assert c_out % co_tile == 0
    num_co = c_out // co_tile

    # Lane-dense L tile: largest multiple of 128 that divides L AND keeps the
    # working set under a v7x-safe VMEM budget (64 MiB physical there).
    if l_tile is None:
        cands = [c for c in (4096, 2048, 1024, 512, 256, 128) if length % c == 0]
        l_tile = length
        for c in cands:
            if _vmem_estimate_bytes(c_in, co_tile, c, kernel_size, pad,
                                    dt_bytes) <= vmem_budget_bytes:
                l_tile = c
                break
        else:
            if cands:
                l_tile = cands[-1]
    assert length % l_tile == 0, "L must be a multiple of l_tile"
    assert pad <= l_tile, \
        "causal receptive field must fit inside one previous L tile"
    num_l = length // l_tile
    # Carry only the receptive-field tail, rounded up to a 128-lane boundary
    # so both the store into the carry and the reload stay lane-aligned.
    pad_lanes = 0 if pad == 0 else min(l_tile, -(-pad // 128) * 128)

    # (C_out, K*C_in): w_stk[co, k*C_in + ci] = W[co, ci, k]  -> one deep matmul.
    w_stk = jnp.transpose(weight, (0, 2, 1)).reshape(c_out, kernel_size * c_in)
    if bias is None:
        bias = jnp.zeros((c_out,), x.dtype)
    b2 = bias.reshape(c_out, 1)

    kernel = functools.partial(
        _causal_conv1d_kernel, kernel_size=kernel_size, dilation=dilation,
        l_tile=l_tile, pad_lanes=pad_lanes, precision=precision)

    scratch_shapes = []
    if pad_lanes > 0:
        scratch_shapes.append(pltpu.VMEM((c_in, pad_lanes), x.dtype))

    return pl.pallas_call(
        kernel,
        out_shape=jax.ShapeDtypeStruct((n, c_out, length), x.dtype),
        grid_spec=pltpu.PrefetchScalarGridSpec(
            num_scalar_prefetch=0,
            # L last: it carries the causal state.  N and C_out are independent
            # (megacore-shardable on v7x even when N == 1).
            grid=(n, num_co, num_l),
            in_specs=[
                pl.BlockSpec((1, c_in, l_tile), lambda b, j, l: (b, 0, l)),
                # Constant-in-L index maps -> weight/bias DMA'd only when the
                # C_out tile changes, VMEM-resident across the L loop.
                pl.BlockSpec((co_tile, kernel_size * c_in),
                             lambda b, j, l: (j, 0)),
                pl.BlockSpec((co_tile, 1), lambda b, j, l: (j, 0)),
            ],
            out_specs=pl.BlockSpec((1, co_tile, l_tile),
                                   lambda b, j, l: (b, j, l)),
            scratch_shapes=scratch_shapes,
        ),
        compiler_params=pltpu.CompilerParams(
            dimension_semantics=("parallel", "parallel", "arbitrary"),
            vmem_limit_bytes=vmem_limit_bytes),
    )(x, w_stk, b2)


def causal_conv1d_reference(x, weight, bias, dilation):
    kernel_size = weight.shape[-1]
    pad = dilation * (kernel_size - 1)
    y = jax.lax.conv_general_dilated(
        x, weight,
        window_strides=(1,),
        padding=[(pad, 0)],
        rhs_dilation=(dilation,),
        dimension_numbers=("NCH", "OIH", "NCH"))
    return y + bias[None, :, None]


if __name__ == "__main__":
    key = jax.random.PRNGKey(0)
    kx, kw, kb = jax.random.split(key, 3)

    n, c_in, c_out, length = 2, 16, 32, 1024
    kernel_size, dilation = 3, 2

    x = jax.random.normal(kx, (n, c_in, length), jnp.float32)
    w = jax.random.normal(kw, (c_out, c_in, kernel_size), jnp.float32) * 0.1
    b = jax.random.normal(kb, (c_out,), jnp.float32)

    # l_tile=256: lane-dense (multiple of 128) and small enough that the causal
    # carry is exercised across several L-tile boundaries (pad_lanes=128 < 256).
    out = jax.block_until_ready(
        causal_conv1d(x, w, b, dilation=dilation, l_tile=256))

    ref = jax.block_until_ready(causal_conv1d_reference(x, w, b, dilation))
    # Both the kernel and the XLA reference conv use the MXU's default (bf16
    # multi-pass) precision for f32 operands; tolerance reflects that choice.
    np.testing.assert_allclose(np.asarray(out), np.asarray(ref),
                               rtol=2e-2, atol=2e-2)
    print("KERNEL_OK")
</pallas_src>

<mosaic_0001>
module attributes {stable_mosaic.version = 11 : i64} {
  func.func @_causal_conv1d_kernel(%arg0: i32, %arg1: i32, %arg2: i32, %arg3: memref<1x16x256xf32, #tpu.memory_space<vmem>>, %arg4: memref<32x48xf32, #tpu.memory_space<vmem>>, %arg5: memref<32x1xf32, #tpu.memory_space<vmem>>, %arg6: memref<1x32x256xf32, #tpu.memory_space<vmem>>, %arg7: memref<16x128xf32, #tpu.memory_space<vmem>>) attributes {dimension_semantics = [#tpu.dimension_semantics<parallel>, #tpu.dimension_semantics<parallel>, #tpu.dimension_semantics<arbitrary>], iteration_bounds = array<i64: 2, 1, 4>, scalar_prefetch = 0 : i64, scratch_operands = 1 : i64, tpu.core_type = #tpu.core_type<tc>, window_params = [{transform_indices = @transform_0, window_bounds = array<i64: 1, 16, 256>}, {transform_indices = @transform_1, window_bounds = array<i64: 32, 48>}, {transform_indices = @transform_2, window_bounds = array<i64: 32, 1>}, {transform_indices = @transform_3, window_bounds = array<i64: 1, 32, 256>}]} {
    %c0 = arith.constant 0 : index
    %c0_0 = arith.constant 0 : index
    %c0_1 = arith.constant 0 : index
    %0 = vector.load %arg3[%c0, %c0_0, %c0_1] : memref<1x16x256xf32, #tpu.memory_space<vmem>>, vector<1x16x256xf32>
    %1 = vector.shape_cast %0 : vector<1x16x256xf32> to vector<16x256xf32>
    %c0_i32 = arith.constant 0 : i32
    %2 = arith.cmpi eq, %arg2, %c0_i32 : i32
    %3 = arith.extui %2 : i1 to i32
    %c0_i32_2 = arith.constant 0 : i32
    %4 = arith.cmpi ne, %3, %c0_i32_2 : i32
    scf.if %4 {
      %cst_14 = arith.constant 0.000000e+00 : f32
      %21 = vector.broadcast %cst_14 : f32 to vector<16x128xf32>
      %c0_15 = arith.constant 0 : index
      %c0_16 = arith.constant 0 : index
      %22 = vector.load %arg7[%c0_15, %c0_16] : memref<16x128xf32, #tpu.memory_space<vmem>>, vector<16x128xf32>
      tpu.vector_store %arg7[%c0_15, %c0_16], %21 {strides = array<i32>} : memref<16x128xf32, #tpu.memory_space<vmem>>, vector<16x128xf32>,
    } else {
    }
    %c0_3 = arith.constant 0 : index
    %c0_4 = arith.constant 0 : index
    %5 = vector.load %arg7[%c0_3, %c0_4] : memref<16x128xf32, #tpu.memory_space<vmem>>, vector<16x128xf32>
    %6 = tpu.concatenate %5, %1 in 1 : vector<16x128xf32>, vector<16x256xf32> -> vector<16x384xf32>
    %7 = vector.extract_strided_slice %1 {offsets = [0, 128], sizes = [16, 128], strides = [1, 1]} : vector<16x256xf32> to vector<16x128xf32>
    %c0_5 = arith.constant 0 : index
    %c0_6 = arith.constant 0 : index
    %8 = vector.load %arg7[%c0_5, %c0_6] : memref<16x128xf32, #tpu.memory_space<vmem>>, vector<16x128xf32>
    tpu.vector_store %arg7[%c0_5, %c0_6], %7 {strides = array<i32>} : memref<16x128xf32, #tpu.memory_space<vmem>>, vector<16x128xf32>,
    %9 = vector.extract_strided_slice %6 {offsets = [0, 124], sizes = [16, 256], strides = [1, 1]} : vector<16x384xf32> to vector<16x256xf32>
    %10 = vector.extract_strided_slice %6 {offsets = [0, 126], sizes = [16, 256], strides = [1, 1]} : vector<16x384xf32> to vector<16x256xf32>
    %11 = vector.extract_strided_slice %6 {offsets = [0, 128], sizes = [16, 256], strides = [1, 1]} : vector<16x384xf32> to vector<16x256xf32>
    %12 = tpu.concatenate %9, %10, %11 in 0 : vector<16x256xf32>, vector<16x256xf32>, vector<16x256xf32> -> vector<48x256xf32>
    %c0_7 = arith.constant 0 : index
    %c0_8 = arith.constant 0 : index
    %13 = vector.load %arg4[%c0_7, %c0_8] : memref<32x48xf32, #tpu.memory_space<vmem>>, vector<32x48xf32>
    %cst = arith.constant dense<0.000000e+00> : vector<32x256xf32>
    %14 = tpu.matmul %13, %12, %cst {dimension_numbers = #tpu.dot_dimension_numbers<[1], [0], [0], [1], [0, 0, 1, 1], [], []>} : vector<32x48xf32>, vector<48x256xf32>, vector<32x256xf32> -> vector<32x256xf32>
    %c0_9 = arith.constant 0 : index
    %c0_10 = arith.constant 0 : index
    %15 = vector.load %arg5[%c0_9, %c0_10] : memref<32x1xf32, #tpu.memory_space<vmem>>, vector<32x1xf32>
    %16 = vector.broadcast %15 : vector<32x1xf32> to vector<32x256xf32>
    %17 = arith.addf %14, %16 : vector<32x256xf32>
    %c0_11 = arith.constant 0 : index
    %c0_12 = arith.constant 0 : index
    %c0_13 = arith.constant 0 : index
    %18 = vector.load %arg6[%c0_11, %c0_12, %c0_13] : memref<1x32x256xf32, #tpu.memory_space<vmem>>, vector<1x32x256xf32>
    %19 = vector.shape_cast %18 : vector<1x32x256xf32> to vector<32x256xf32>
    %20 = vector.shape_cast %17 : vector<32x256xf32> to vector<1x32x256xf32>
    tpu.vector_store %arg6[%c0_11, %c0_12, %c0_13], %20 {strides = array<i32>} : memref<1x32x256xf32, #tpu.memory_space<vmem>>, vector<1x32x256xf32>,
    return
  }
  func.func @transform_0(%arg0: i32, %arg1: i32, %arg2: i32) -> (i32, i32, i32) {
    %c0_i32 = arith.constant 0 : i32
    %c0_i32_0 = arith.constant 0 : i32
    return %arg0, %c0_i32, %arg2 : i32, i32, i32
  }
  func.func @transform_1(%arg0: i32, %arg1: i32, %arg2: i32) -> (i32, i32) {
    %c0_i32 = arith.constant 0 : i32
    %c0_i32_0 = arith.constant 0 : i32
    return %arg1, %c0_i32 : i32, i32
  }
  func.func @transform_2(%arg0: i32, %arg1: i32, %arg2: i32) -> (i32, i32) {
    %c0_i32 = arith.constant 0 : i32
    %c0_i32_0 = arith.constant 0 : i32
    return %arg1, %c0_i32 : i32, i32
  }
  func.func @transform_3(%arg0: i32, %arg1: i32, %arg2: i32) -> (i32, i32, i32) {
    %c0_i32 = arith.constant 0 : i32
    return %arg0, %arg1, %arg2 : i32, i32, i32
  }
}

</mosaic_0001>

<bundles_post_ra>
// kernel: tpu_custom_call.1
= control target key start
LH: loop header
LB: loop body
LE: loop exit
PB: predicated region body
PF: predicated region fallthrough
CT: control target
= control target key end

     0   :  { %8 = vsyncpa [#allocation4], 0  ;;  %s1287_s0 = inlined_call_operand.hbm [shape: f32[2,16,1024], index: 0, kind: input, shape index: {}]   ;;  %s1288_s1 = inlined_call_operand.vmem [shape: f32[32,48], index: 1, kind: input, shape index: {}]   ;;  %s1289_s2 = inlined_call_operand.vmem [shape: f32[32,1], index: 2, kind: input, shape index: {}]   ;;  %s1290_s3 = inlined_call_operand.hbm [shape: f32[2,32,1024], index: 3, kind: output, shape index: {}]  }
   0x1   :  { %10 = vsyncpa [#allocation4 + $0x1], 0 }
   0x2   :  { %11 = vsyncpa [#allocation5], 0 }
   0x3   :  { %13 = vsyncpa [#allocation5 + $0x1], 0  ;;  %s1022_s12 = smov 0   ;;  %s1024_s13 = smov 0  }
   0x4   :  { %s1026_s14 = smov 0   ;;  %s1028_s15 = smov 0  }
   0x5   :  { %s1030_s16 = smov 0   ;;  %s1032_s17 = smov 0  }
   0x6   :  { %s1034_s18 = smov 0   ;;  %s1036_s19 = smov 0  }
   0x7 LB: > { %s654_s20 = sadd.s32 4294967295, %s986_s19   ;;  %s655_s21 = sadd.s32 4294967294, %s986_s19   ;;  %s986_s19 = sphi %s1036_s19, %s19_s19   ;;  %s982_s18 = sphi %s1034_s18, %s1306_s18   ;;  %s978_s17 = sphi %s1032_s17, %s1305_s17   ;;  %s974_s16 = sphi %s1030_s16, %s1304_s16   ;;  %s970_s15 = sphi %s1028_s15, %s1303_s15   ;;  %s966_s14 = sphi %s1026_s14, %s1302_s14   ;;  %s962_s13 = sphi %s1024_s13, %s1301_s13   ;;  %s958_s12 = sphi %s1022_s12, %s1300_s12  }
   0x8   : > { %s31_s22 = sadd.s32 1, %s978_s17  ;;  %s38_s23 = sadd.s32 1, %s982_s18 }
   0x9   : > { %p32_p0 = scmp.ge.s32.totalorder %s31_s22, 4  ;;  %s47_s24 = sadd.s32 1, %s966_s14 }
   0xa   : > { %p54_p1 = scmp.ne.s32.totalorder %s966_s14, %s962_s13  ;;  %p55_p2 = scmp.eq.s32.totalorder %s986_s19, 0 }
   0xb   : > { %s1308_s22 = smov (%p32_p0, %s31_s22), 0  ;;  %s1310_s23 = smov (!%p32_p0, %s38_s23), %s982_s18 }
   0xc   : > { %s43_s25 = ssub.s32 %s978_s17, %s1308_s22  ;;  %p1075_p3 = por %p55_p2, %p54_p1 }
   0xd   : > { %p40_p4 = scmp.ge.s32.totalorder %s1310_s23, 2  ;;  %p60_p5 = scmp.ne.s32.totalorder %s962_s13, %s958_s12 }
   0xe   : > { %p61_p6 = scmp.eq.s32.totalorder %s654_s20, 0  ;;  %p140_p7 = scmp.eq.s32.totalorder %s654_s20, 7 }
   0xf   : > { %s1312_s23 = smov (%p40_p4, %s1310_s23), 0  ;;  %p146_p10 = scmp.eq.s32.totalorder %s655_s21, 7 }
  0x10   : > { %p1083_p8 = por %p61_p6, %p60_p5  ;;  %p1087_p9 = por %p140_p7, %p54_p1 }
  0x11   : > { %s42_s29 = ssub.s32 %s982_s18, %s1312_s23  ;;  %p1093_p12 = por %p146_p10, %p60_p5 }
  0x12   : > { %s1294_s28 = scalar_select %p1087_p9, 1, 0 }
  0x13   : > { %s44_s30 = sor.u32 %s43_s25, %s42_s29  ;;  %p708_p13 = scmp.lt.s32.totalorder %s986_s19, 8 }
  0x14   : > { %p45_p11 = scmp.eq.s32.totalorder %s44_s30, 0  ;;  %s184_s5 = sand.u32 1, %s966_s14  }
  0x15   : > { %s1295_s4 = scalar_select %p1093_p12, 1, 0 }
  0x16   : > { %s1100_s6 = scalar_select %p45_p11, %s966_s14, %s47_s24  }
  0x17   : > { %s660_s7 = sshll.u32 %s184_s5, 5  ;;  %s661_s8 = sshll.u32 %s978_s17, 1 }
  0x18   : > { %s662_s9 = sshll.u32 %s982_s18, 4  ;;  %s188_s10 = scalar_lea.vmem [#allocation3], %s660_s7 }
  0x19   : > { %s197_s11 = sshll.u32 %s188_s10, 4  ;;  %s194_s20 = sadd.s32 %s662_s9, %s661_s8  ;;  %s1104_s11 = int_to_ptr.vmem [resolvable:$true] %s197_s11 }
  0x1a   : > { %s663_s21 = sshll.u32 %s194_s20, 7  ;;  %p1108_p0 = pnand %p708_p13, %p1075_p3 }
  0x1b   : > { %s1115_s24 = scalar_lea.hbm %s1287_s0, %s663_s21  ;;  %s1118_s7 = scalar_lea.sflag [#allocation4], %s184_s5 }
  0x1c   : > { %s858_s8 = scalar_lea.hbm %s1115_s24, 512  ;;  %p860_p3 = pneg %p1108_p0 }
  0x1d   : > { %p859_p2 = scmp.ne.s32.totalorder %s1115_s24, %s858_s8  ;;  %s863_s10 = scalar_lea.hbm %s1287_s0, 4096 }
  0x1e   : > { %p864_p6 = scmp.lt.u32.totalorder %s1115_s24, %s1287_s0  ;;  %p865_p7 = scmp.lt.u32.totalorder %s863_s10, %s858_s8 }
  0x1f   : > { %p861_p4 = pnand %p860_p3, %p859_p2  ;;  %p867_p11 = scmp.lt.u32.totalorder %s858_s8, %s1115_s24 }
  0x20   : > { %p866_p10 = por %p865_p7, %p864_p6 }
  0x21   : > { %p862_p5 = pneg %p861_p4 }
  0x22   : > { %p868_p13 = por %p867_p11, %p866_p10 }
  0x24   : > { %p869_p1 = pnand %p868_p13, %p862_p5 }
  0x26   : > { %872 = shalt.err (!%p869_p1)
}
  0x27   : > { %s873_s5 = scalar_lea.vmem %s1104_s11, 512  ;;  %s988_s29 = smov [#allocation3]  }
  0x28   : > { %p874_p2 = scmp.ne.s32.totalorder %s1104_s11, %s873_s5  ;;  %s878_s30 = sshll.u32 %s988_s29, 4  ;;  %s879_s30 = int_to_ptr.vmem [resolvable:$false] %s878_s30 }
  0x29   : > { %s880_s26 = scalar_lea.vmem %s879_s30, 1024  ;;  %p881_p9 = scmp.lt.s32.totalorder %s1104_s11, %s879_s30 }
  0x2a   : > { %p876_p4 = pnand %p874_p2, %p860_p3  ;;  %p882_p6 = scmp.lt.s32.totalorder %s880_s26, %s873_s5 }
  0x2c   : > { %p877_p12 = pneg %p876_p4  ;;  %p883_p7 = por %p882_p6, %p881_p9 }
  0x2e   : > { %p884_p10 = pnand %p883_p7, %p877_p12 }
  0x30   : > { %887 = shalt.err (!%p884_p10)
}
  0x31   : > { %s989_s8 = smov 1024   ;;  %s990_s9 = smov 256  }
  0x32   : > { %s991_s10 = smov 16   ;;  %p205_p1 = scmp.lt.s32.totalorder %s986_s19, 9 }
  0x33   : > { %703 = dma.hbm_to_vmem [thread:$0]  (!%p1108_p0), %s1115_s24, 512, %s1104_s11, %s1118_s7, %s989_s8, %s990_s9, %s991_s10  }
  0x34   : > { %p1297_p3 = scmp.ge.s32.totalorder %s986_s19, 1 }
  0x36   : > { %p206_p5 = pnand %p1297_p3, %p205_p1 }
  0x37   : > { %s1150_s20 = sand.u32 (!%p206_p5), 1, %s962_s13  }
  0x38   : > { %209 = sbr.rel (%p206_p5) target bundleno = 565 (0x235), region = 32  ;;  %s665_s21 = sshll.u32 (!%p206_p5), %s1150_s20, 5 }
  0x39   : > { %s212_s5 = scalar_lea.sflag (!%p206_p5), [#allocation4], %s1150_s20  ;;  %s215_s29 = scalar_lea.vmem (!%p206_p5), [#allocation3], %s665_s21 }
  0x3f   : > { %949 = dma.done.wait (%p1083_p8), %s212_s5, 512  }
  0x40   : > { %951 = vsyncadd (%p1083_p8), %s212_s5, 4294966784  ;;  %s666_s11 = sshll.u32 %s1150_s20, 6  ;;  %v263_v0 = vld [vmem:[%s215_s29] sm:$0xff]  ;;  %v264_v1 = vld [vmem:[%s215_s29 + $0x8] sm:$0xff]  ;;  %p667_p9 = scmp.ne.s32.totalorder %s970_s15, 0 }
  0x41   : > { %v265_v2 = vld [vmem:[%s215_s29 + $0x10] sm:$0xff]  ;;  %v266_v3 = vld [vmem:[%s215_s29 + $0x18] sm:$0xff]  ;;  %s1159_s25 = scalar_lea.vmem [#allocation6], %s666_s11  ;;  %v992_v4 = vmov (!%p667_p9), 0.0  }
  0x42   : > { %270 = sbr.rel (%p667_p9) target bundleno = 73 (0x49), region = 40  ;;  %271 = vst [vmem:[#allocation2] sm:$0xff] (!%p667_p9), %v992_v4  ;;  %272 = vst [vmem:[#allocation2 + $0x8] sm:$0xff] (!%p667_p9), %v992_v4 }
  0x49 PF: > { %v786_v5 = vpack.i.bf16 %v264_v1, %v263_v0  ;;  %v273_v6 = vld [vmem:[#allocation2] sm:$0xff]  ;;  %v274_v7 = vld [vmem:[#allocation2 + $0x8] sm:$0xff]  ;;  %s993_s27 = smov 126   ;;  %v791_v9 = vpack.i.bf16 %v266_v3, %v265_v2  ;;  %s994_s24 = smov 124   ;;  %vm295_vm0 = vcmask 1031168   ;;  %vm308_vm1 = vcmask 1014784  }
  0x4a   : > { %276 = vst [vmem:[#allocation2 + $0x8] sm:$0xff] %v266_v3  ;;  %v796_v8 = vpack.i.bf16 %v274_v7, %v273_v6  ;;  %275 = vst [vmem:[#allocation2] sm:$0xff] %v264_v1  ;;  %s995_s7 = smov 4   ;;  %vm375_vm2 = vcmask 31744   ;;  %v996_v38 = vmov 0.0   ;;  %v316_v53 = vld [vmem:[%s1289_s2 + $0x8] sm:$0xff] }
  0x4b   : > { %787 = vrot.lane.b32.xlu0 %v786_v5, %s993_s27  ;;  %477 = vmatprep.mubr.f32.mxu0 %v996_v38  ;;  %v315_v54 = vld [vmem:[%s1289_s2] sm:$0xff]  ;;  %v997_v55 = vmov 0   ;;  %v317_v56 = vld [vmem:[%s1289_s2 + $0x10] sm:$0xff]  ;;  %v318_v57 = vld [vmem:[%s1289_s2 + $0x18] sm:$0xff]  ;;  %vm400_vm3 = vcmask 392192   ;;  %s673_s10 = sshll.u32 %s970_s15, 1 }
  0x4c   : > { %797 = vrot.lane.b32.xlu1 %v796_v8, %s993_s27  ;;  %489 = vmatprep.mubr.f32.mxu1 %v996_v38  ;;  %s674_s21 = sshll.u32 %s974_s16, 5  ;;  %s529_s11 = sshll.u32 %s1159_s25, 4  ;;  %s1229_s11 = int_to_ptr.vmem [resolvable:$true] %s529_s11 }
  0x4d   : > { %857 = vset.pattern.permute.xlu1 %v997_v55  ;;  %856 = vset.pattern.permute.xlu0 %v997_v55  ;;  %s526_s5 = sadd.s32 %s674_s21, %s673_s10  ;;  %p1298_p12 = scmp.ne.s32.totalorder %s1294_s28, 0 }
  0x4e   : > { %s675_s29 = sshll.u32 %s526_s5, 7  ;;  %s998_s30 = smov [#allocation6]  }
  0x4f   : > { %792 = vrot.lane.b32.xlu0 %v791_v9, %s993_s27  ;;  %s1227_s27 = scalar_lea.hbm %s1290_s3, %s675_s29  ;;  %s892_s26 = sshll.u32 %s998_s30, 4  ;;  %s893_s26 = int_to_ptr.vmem [resolvable:$false] %s892_s26 }
  0x50   : > { %802 = vrot.lane.b32.xlu1 %v786_v5, %s994_s24  ;;  %s894_s8 = scalar_lea.vmem %s893_s26, 2048  ;;  %p895_p13 = scmp.lt.s32.totalorder %s1229_s11, %s893_s26 }
  0x53   : > { %807 = vrot.lane.b32.xlu0 %v791_v9, %s994_s24  ;;  %s511_s24 = scalar_lea.sflag [#allocation5], %s1150_s20 }
  0x54   : > { %812 = vrot.lane.b32.xlu1 %v786_v5, %s995_s7 }
  0x57   : > { %817 = vrot.lane.b32.xlu0 %v791_v9, %s995_s7 }
  0x58   : > { %822 = vrot.lane.b32.xlu1 %v796_v8, %s995_s7 }
  0xbd   : > { %v788_v10 = vpop.permute.xlu0 %787 }
  0xbe   : > { %v790_v11 = vunpack.i.h.bf16 %v788_v10  ;;  %v789_v12 = vunpack.i.l.bf16 %v788_v10  ;;  %v798_v13 = vpop.permute.xlu1 %797 }
  0xbf   : > { %v800_v15 = vunpack.i.h.bf16 %v798_v13  ;;  %v799_v16 = vunpack.i.l.bf16 %v798_v13 }
  0xc0   : > { %v297_v14 = vsel %vm295_vm0, %v789_v12, %v790_v11 }
  0xc1   : > { %v826_v17 = vpack.i.bf16 %v790_v11, %v297_v14  ;;  %v793_v18 = vpop.permute.xlu0 %792  ;;  %v296_v25 = vsel %vm295_vm0, %v799_v16, %v789_v12 }
  0xc2   : > { %v795_v19 = vunpack.i.h.bf16 %v793_v18  ;;  %v794_v20 = vunpack.i.l.bf16 %v793_v18  ;;  %v803_v21 = vpop.permute.xlu1 %802 }
  0xc3   : > { %827 = vrot.lane.b32.xlu0 %v826_v17, %s995_s7  ;;  %v805_v22 = vunpack.i.h.bf16 %v803_v21  ;;  %v804_v23 = vunpack.i.l.bf16 %v803_v21 }
  0xc4   : > { %v299_v24 = vsel %vm295_vm0, %v794_v20, %v795_v19  ;;  %v298_v26 = vsel %vm295_vm0, %v800_v15, %v794_v20 }
  0xc5   : > { %v831_v27 = vpack.i.bf16 %v795_v19, %v299_v24  ;;  %v309_v28 = vsel %vm308_vm1, %v804_v23, %v805_v22  ;;  %v808_v29 = vpop.permute.xlu0 %807  ;;  %v836_v30 = vpack.i.bf16 %v298_v26, %v296_v25  ;;  %v311_v24 = vld [vmem:[%s1288_s1] sm:$0xff]  ;;  %v313_v25 = vld [vmem:[%s1288_s1 + $0x10] sm:$0xff]  ;;  %v312_v26 = vld [vmem:[%s1288_s1 + $0x8] sm:$0xff] }
  0xc6   : > { %v810_v31 = vunpack.i.h.bf16 %v808_v29  ;;  %v809_v32 = vunpack.i.l.bf16 %v808_v29  ;;  %v813_v33 = vpop.permute.xlu1 %812  ;;  %v841_v34 = vpack.i.bf16 %v805_v22, %v309_v28 }
  0xc7   : > { %832 = vrot.lane.b32.xlu1 %v831_v27, %s995_s7  ;;  %837 = vrot.lane.b32.xlu0 %v836_v30, %s995_s7  ;;  %v815_v35 = vunpack.i.h.bf16 %v813_v33  ;;  %v814_v36 = vunpack.i.l.bf16 %v813_v33  ;;  %v314_v27 = vld [vmem:[%s1288_s1 + $0x18] sm:$0xff] }
  0xc8   : > { %v310_v37 = vsel %vm308_vm1, %v809_v32, %v810_v31  ;;  %v851_v48 = vpack.i.bf16 %v809_v32, %v804_v23 }
  0xc9   : > { %v846_v39 = vpack.i.bf16 %v810_v31, %v310_v37  ;;  %v818_v40 = vpop.permute.xlu0 %817  ;;  %v377_v44 = vsel %vm375_vm2, %v814_v36, %v815_v35 }
  0xca   : > { %v820_v41 = vunpack.i.h.bf16 %v818_v40  ;;  %v819_v42 = vunpack.i.l.bf16 %v818_v40  ;;  %v823_v43 = vpop.permute.xlu1 %822 }
  0xcb   : > { %842 = vrot.lane.b32.xlu1 %v841_v34, %s995_s7  ;;  %847 = vrot.lane.b32.xlu0 %v846_v39, %s995_s7  ;;  %v825_v45 = vunpack.i.h.bf16 %v823_v43  ;;  %v824_v46 = vunpack.i.l.bf16 %v823_v43 }
  0xcc   : > { %v379_v47 = vsel %vm375_vm2, %v819_v42, %v820_v41 }
  0xcd   : > { %v678_v49 = vpack.c.bf16 %v379_v47, %v377_v44  ;;  %v376_v50 = vsel %vm375_vm2, %v824_v46, %v814_v36  ;;  %v378_v51 = vsel %vm375_vm2, %v825_v45, %v819_v42 }
  0xce   : > { %v680_v52 = vpack.c.bf16 %v378_v51, %v376_v50 }
  0xcf   : > { %852 = vrot.lane.b32.xlu1 %v851_v48, %s995_s7  ;;  %679 = vmatprep.subr.bf16.mxu0 %v678_v49  ;;  %s888_s7 = scalar_lea.vmem %s1229_s11, 1024 }
  0xd0   : > { %690 = vmatprep.subr.bf16.mxu1 %v678_v49  ;;  %681 = vmatpush1.bf16.msra.mxu0 %v680_v52  ;;  %p889_p8 = scmp.ne.s32.totalorder %s1229_s11, %s888_s7  ;;  %p896_p2 = scmp.lt.s32.totalorder %s894_s8, %s888_s7 }
  0xd1   : > { %693 = vmatpush1.bf16.msra.mxu1 %v680_v52  ;;  %321 = vperm.xlu0 %856, %v315_v54  }
  0xd2   : > { %p890_p0 = pnand %p889_p8, %p1298_p12  ;;  %p897_p4 = por %p896_p2, %p895_p13 }
  0xd3   : > { %326 = vperm.xlu1 %857, %v316_v53  }
  0xd4   : > { %p891_p11 = pneg %p890_p0 }
  0xd5   : > { %336 = vperm.xlu0 %856, %v318_v57  }
  0xd6   : > { %p898_p6 = pnand %p897_p4, %p891_p11 }
  0xd7   : > { %331 = vperm.xlu1 %857, %v317_v56  }
 0x135   : > { %v828_v58 = vpop.permute.xlu0 %827 }
 0x136   : > { %v830_v59 = vunpack.i.h.bf16 %v828_v58  ;;  %v829_v60 = vunpack.i.l.bf16 %v828_v58 }
 0x138   : > { %v381_v3 = vsel %vm375_vm2, %v829_v60, %v830_v59 }
 0x139   : > { %v833_v61 = vpop.permute.xlu1 %832  ;;  %v838_v62 = vpop.permute.xlu0 %837 }
 0x13a   : > { %v835_v63 = vunpack.i.h.bf16 %v833_v61  ;;  %v834_v0 = vunpack.i.l.bf16 %v833_v61  ;;  %v840_v1 = vunpack.i.h.bf16 %v838_v62  ;;  %v839_v2 = vunpack.i.l.bf16 %v838_v62 }
 0x13c   : > { %v383_v4 = vsel %vm375_vm2, %v834_v0, %v835_v63  ;;  %v380_v5 = vsel %vm375_vm2, %v839_v2, %v829_v60  ;;  %v382_v6 = vsel %vm375_vm2, %v840_v1, %v834_v0 }
 0x13d   : > { %v843_v7 = vpop.permute.xlu1 %842  ;;  %v848_v8 = vpop.permute.xlu0 %847  ;;  %v682_v9 = vpack.c.bf16 %v383_v4, %v381_v3  ;;  %v684_v10 = vpack.c.bf16 %v382_v6, %v380_v5 }
 0x13e   : > { %v845_v11 = vunpack.i.h.bf16 %v843_v7  ;;  %v844_v12 = vunpack.i.l.bf16 %v843_v7  ;;  %v850_v13 = vunpack.i.h.bf16 %v848_v8  ;;  %v849_v14 = vunpack.i.l.bf16 %v848_v8 }
 0x13f   : > { %683 = vmatprep.subr.bf16.mxu0 %v682_v9  ;;  %691 = vmatprep.subr.bf16.mxu1 %v682_v9 }
 0x140   : > { %685 = vmatpush1.bf16.msra.mxu0 %v684_v10  ;;  %694 = vmatpush1.bf16.msra.mxu1 %v684_v10  ;;  %v385_v15 = vsel %vm375_vm2, %v844_v12, %v845_v11  ;;  %v387_v16 = vsel %vm375_vm2, %v849_v14, %v850_v13 }
 0x141   : > { %v853_v17 = vpop.permute.xlu1 %852  ;;  %v686_v18 = vpack.c.bf16 %v387_v16, %v385_v15 }
 0x142   : > { %v855_v19 = vunpack.i.h.bf16 %v853_v17  ;;  %v854_v20 = vunpack.i.l.bf16 %v853_v17 }
 0x143   : > { %687 = vmatprep.subr.bf16.mxu0 %v686_v18  ;;  %692 = vmatprep.subr.bf16.mxu1 %v686_v18 }
 0x144   : > { %v384_v21 = vsel %vm375_vm2, %v854_v20, %v844_v12  ;;  %v386_v22 = vsel %vm375_vm2, %v855_v19, %v849_v14 }
 0x145   : > { %v688_v23 = vpack.c.bf16 %v386_v22, %v384_v21 }
 0x147   : > { %689 = vmatpush1.bf16.msra.mxu0 %v688_v23  ;;  %695 = vmatpush1.bf16.msra.mxu1 %v688_v23 }
 0x14a   : > { %668 = vmatmul.mubr.msk.f32.vlgmr.msra.gmra.mrb[0].mxu0 %vm400_vm3, %v311_v24  ;;  %670 = vmatmul.mubr.msk.f32.vlgmr.msra.gmra.mrb[0].mxu1 %vm400_vm3, %v313_v25 }
 0x14b   : > { %483 = vmatprep.mubr.f32.mxu0 %v996_v38  ;;  %495 = vmatprep.mubr.f32.mxu1 %v996_v38 }
 0x14e   : > { %669 = vmatmul.mubr.msk.f32.gmra.mrb[2].mxu0 %vm400_vm3, %v312_v26  ;;  %671 = vmatmul.mubr.msk.f32.gmra.mrb[2].mxu1 %vm400_vm3, %v314_v27 }
 0x150   : > { %v322_v29 = vpop.permute.xlu0 %321 }
 0x152   : > { %v327_v28 = vpop.permute.xlu1 %326 }
 0x154   : > { %v337_v39 = vpop.permute.xlu0 %336 }
 0x156   : > { %v332_v30 = vpop.permute.xlu1 %331 }
 0x21d   : > { %v479_v31 = vpop.f32.mrb[0].mxu0  ;;  %v491_v32 = vpop.f32.mrb[0].mxu1 }
 0x21e   : > { %v480_v33 = vadd.f32 %v479_v31, %v322_v29  ;;  %v492_v34 = vadd.f32 %v491_v32, %v332_v30  ;;  %v481_v35 = vpop.f32.mrb[1].mxu0  ;;  %v493_v36 = vpop.f32.mrb[1].mxu1 }
 0x21f   : > { %v482_v37 = vadd.f32 %v481_v35, %v322_v29  ;;  %v494_v38 = vadd.f32 %v493_v36, %v332_v30 }
 0x220   : > { %502 = vst [vmem:[%s1159_s25] sm:$0xff] %v480_v33  ;;  %506 = vst [vmem:[%s1159_s25 + $0x20] sm:$0xff] %v492_v34 }
 0x221   : > { %503 = vst [vmem:[%s1159_s25 + $0x8] sm:$0xff] %v482_v37  ;;  %507 = vst [vmem:[%s1159_s25 + $0x28] sm:$0xff] %v494_v38  ;;  %v485_v40 = vpop.f32.mrb[2].mxu0  ;;  %v497_v41 = vpop.f32.mrb[2].mxu1 }
 0x222   : > { %v486_v42 = vadd.f32 %v485_v40, %v327_v28  ;;  %v498_v43 = vadd.f32 %v497_v41, %v337_v39  ;;  %v487_v44 = vpop.f32.mrb[3].mxu0  ;;  %v499_v45 = vpop.f32.mrb[3].mxu1 }
 0x223   : > { %v488_v46 = vadd.f32 %v487_v44, %v327_v28  ;;  %v500_v47 = vadd.f32 %v499_v45, %v337_v39 }
 0x224   : > { %504 = vst [vmem:[%s1159_s25 + $0x10] sm:$0xff] %v486_v42  ;;  %508 = vst [vmem:[%s1159_s25 + $0x30] sm:$0xff] %v498_v43 }
 0x225   : > { %505 = vst [vmem:[%s1159_s25 + $0x18] sm:$0xff] %v488_v46  ;;  %509 = vst [vmem:[%s1159_s25 + $0x38] sm:$0xff] %v500_v47 }
 0x226   : > { %901 = shalt.err (!%p898_p6)
}
 0x227   : > { %s902_s25 = scalar_lea.hbm %s1227_s27, 1024  ;;  %s906_s21 = scalar_lea.hbm %s1290_s3, 8192 }
 0x228   : > { %p903_p7 = scmp.ne.s32.totalorder %s1227_s27, %s902_s25  ;;  %p907_p3 = scmp.lt.u32.totalorder %s1227_s27, %s1290_s3 }
 0x229   : > { %p908_p5 = scmp.lt.u32.totalorder %s906_s21, %s902_s25  ;;  %p910_p8 = scmp.lt.u32.totalorder %s902_s25, %s1227_s27 }
 0x22a   : > { %p904_p10 = pnand %p903_p7, %p1298_p12 }
 0x22b   : > { %p909_p9 = por %p908_p5, %p907_p3 }
 0x22c   : > { %p905_p1 = pneg %p904_p10 }
 0x22d   : > { %p911_p0 = por %p910_p8, %p909_p9 }
 0x22f   : > { %p912_p11 = pnand %p911_p0, %p905_p1 }
 0x231   : > { %915 = shalt.err (!%p912_p11)
}
 0x232   : > { %s999_s15 = smov 256   ;;  %s1000_s16 = smov 1024  }
 0x233   : > { %s1001_s7 = smov 16  }
 0x234   : > { %698 = dma.vmem_to_hbm [thread:$0]  (%p1298_p12), %s1229_s11, 1024, %s1227_s27, %s511_s24, %s999_s15, %s1000_s16, %s1001_s7  }
 0x235 PF: > { %p709_p13 = scmp.ge.s32.totalorder %s986_s19, 2  ;;  %s544_s30 = sand.u32 1, %s958_s12  }
 0x236   : > { %p1299_p2 = scmp.ne.s32.totalorder %s1295_s4, 0  ;;  %s545_s26 = scalar_lea.sflag [#allocation5], %s544_s30 }
 0x238   : > { %p705_p4 = pnand %p709_p13, %p1299_p2 }
 0x23a   : > { %953 = dma.done.wait (!%p705_p4), %s545_s26, 1024  }
 0x23b   : > { %955 = vsyncadd (!%p705_p4), %s545_s26, 4294966272  ;;  %s19_s19 = sadd.s32 1, %s986_s19   ;;  %s1300_s12 = smov %s962_s13 }
 0x23c   : > { %p16_p6 = scmp.ge.s32.totalorder %s19_s19, 10   ;;  %s1301_s13 = smov %s966_s14 }
 0x23d   : > { %s1302_s14 = smov %s1100_s6  ;;  %s1303_s15 = smov %s978_s17 }
 0x23e   : > { %s1304_s16 = smov %s982_s18  ;;  %s1305_s17 = smov %s1308_s22 }
 0x23f   : > { %s1306_s18 = smov %s1312_s23  ;;  %18 = sbr.rel (!%p16_p6) target bundleno = 7 (0x7), region = 87 }
 0x246   :  { %550 = vsyncpa [#allocation4], 1 }
 0x247   :  { %552 = vsyncpa [#allocation4 + $0x1], 1 }
 0x248   :  { %553 = vsyncpa [#allocation5], 1 }
 0x249   :  { %555 = vsyncpa [#allocation5 + $0x1], 1 }

</bundles_post_ra>
